<compile_context>
chip_gen: v7x
topology: tpu7x:2x2x1
jax: 0.10.0
libtpu: 0.0.40
codegen_flags: <defaults>
</compile_context>

<pallas_src>
import functools

import jax
import jax.numpy as jnp
from jax.experimental import pallas as pl
from jax.experimental.pallas import tpu as pltpu  # noqa: F401  (TPU backend)


def _ig_kernel(xd_ref, w1_ref, w1t_ref, basepre_ref, out_ref, *, steps, n_base):
    """Single invocation: both baselines, closed-form IG, fused mean/max epilogue."""
    S = jnp.float32(steps)
    last = jnp.float32(steps - 1)

    attr = None
    for b in range(n_base):                                # static unroll (2 baselines)
        x_diff = xd_ref[b]                                 # (C, P) = x - baseline_b
        base_pre = basepre_ref[b]                          # (K, 1)

        # Forward pre-activations are linear in alpha:
        #   pre_s[k, p] = base_pre[k] + alpha_s * (W1 @ x_diff)[k, p]
        xd_pre = jnp.dot(w1_ref[...], x_diff,
                         preferred_element_type=jnp.float32)      # (K, P)  matmul #1

        # Closed-form count of ReLU-active steps over alphas = linspace(0,1,steps),
        # preserving the strict `pre > 0` tie-break of the reference loop:
        #   u = -base_pre * (steps-1) / xd_pre
        #   xd_pre > 0 : count s with s > u  -> clip(steps-1 - floor(u), 0, steps)
        #   xd_pre < 0 : count s with s < u  -> clip(ceil(u),            0, steps)
        #   xd_pre == 0: steps if base_pre > 0 else 0
        d = xd_pre
        safe_d = jnp.where(d == 0.0, jnp.float32(1.0), d)
        u = (-base_pre * last) / safe_d                    # (K, P), single broadcast
        cnt_pos = jnp.clip(last - jnp.floor(u), 0.0, S)
        cnt_neg = jnp.clip(jnp.ceil(u), 0.0, S)
        cnt_zero = jnp.where(base_pre > 0.0, S, jnp.float32(0.0))   # (K, 1)
        cnt = jnp.where(d > 0.0, cnt_pos,
                        jnp.where(d < 0.0, cnt_neg, cnt_zero))      # (K, P)

        # grad summed over steps; w2/(P*steps*n_base) already folded into w1t:
        #   attr_b[c, p] = x_diff[c, p] * (W1t_scaled @ cnt)[c, p]
        grad = jnp.dot(w1t_ref[...], cnt,
                       preferred_element_type=jnp.float32)          # (C, P)  matmul #2
        contrib = x_diff * grad
        attr = contrib if attr is None else attr + contrib          # sum == mean (folded)

    # Fused epilogue: XRAI channel aggregation (max over C, a sublane/XLU reduce),
    # lane-dense (1, P) unmasked store.
    out_ref[...] = jnp.max(attr, axis=0, keepdims=True)


def xrai_attribution(im, w1, b1, w2, *, steps=8):
    """im: (C, H, W) float image (matches the PyTorch forward's CHW input).

    Returns the (H, W) pixel-level XRAI attribution map (pre region merge).
    """
    assert steps >= 2
    C, H, W = im.shape
    P = H * W
    K = w1.shape[0]
    n_base = 2

    # Channel-major, lane-dense working layout: (C, P) with P on the lane axis.
    x = im.reshape(C, P).astype(jnp.float32)
    base_vals = jnp.stack([jnp.min(x), jnp.max(x)])        # black / white baselines
    x_diff = x[None] - base_vals[:, None, None]            # (2, C, P)

    w1_kc = w1.astype(jnp.float32)                         # (K, C)
    # Fold w2/(P*steps) (grad scale) and 1/n_base (baseline mean) into W1^T.
    scale = w2.astype(jnp.float32) / jnp.float32(P * steps * n_base)   # (K,)
    w1t_scaled = jnp.transpose(w1_kc * scale[:, None])     # (C, K)
    # base_pre[b, k] = baseline_b * sum_c W1[k, c] + b1[k]
    rowsum = jnp.sum(w1_kc, axis=1)                        # (K,)
    base_pre = (base_vals[:, None] * rowsum[None, :]
                + b1.astype(jnp.float32)[None, :]).reshape(n_base, K, 1)

    kernel = functools.partial(_ig_kernel, steps=steps, n_base=n_base)

    # Single invocation (grid=()): all operands are tiny and live whole in VMEM.
    # TODO(synk): for real image sizes (e.g. 224x224, P=50176) add a pixel-tile
    # grid axis so (K, P_tile) intermediates fit vregs/VMEM (v7x has 64 MiB VMEM).
    sal = pl.pallas_call(
        kernel,
        out_shape=jax.ShapeDtypeStruct((1, P), jnp.float32),
    )(x_diff, w1_kc, w1t_scaled, base_pre)

    return sal.reshape(H, W)


if __name__ == "__main__":
    key = jax.random.PRNGKey(0)
    C, H, W, K = 4, 16, 16, 32
    k_im, k_w1, k_b1, k_w2 = jax.random.split(key, 4)

    # Deterministic example input (single CHW image, as the PyTorch forward expects).
    im = jax.random.uniform(k_im, (C, H, W), dtype=jnp.float32)

    # Deterministic surrogate-net parameters.
    w1 = 0.1 * jax.random.normal(k_w1, (K, C), dtype=jnp.float32)
    b1 = 0.01 * jax.random.normal(k_b1, (K,), dtype=jnp.float32)
    w2 = 0.1 * jax.random.normal(k_w2, (K,), dtype=jnp.float32)

    out = xrai_attribution(im, w1, b1, w2, steps=8)
    out = jax.block_until_ready(out)
    assert out.shape == (H, W)
    assert bool(jnp.all(jnp.isfinite(out)))
    print("KERNEL_OK")
</pallas_src>

<mosaic_0001>
module attributes {stable_mosaic.version = 11 : i64} {
  func.func @_ig_kernel(%arg0: memref<2x4x256xf32, #tpu.memory_space<vmem>>, %arg1: memref<32x4xf32, #tpu.memory_space<vmem>>, %arg2: memref<4x32xf32, #tpu.memory_space<vmem>>, %arg3: memref<2x32x1xf32, #tpu.memory_space<vmem>>, %arg4: memref<1x256xf32, #tpu.memory_space<vmem>>) attributes {dimension_semantics = [], scalar_prefetch = 0 : i64, scratch_operands = 0 : i64, tpu.core_type = #tpu.core_type<tc>} {
    %c0 = arith.constant 0 : index
    %c0_0 = arith.constant 0 : index
    %c0_1 = arith.constant 0 : index
    %0 = vector.load %arg0[%c0, %c0_0, %c0_1] : memref<2x4x256xf32, #tpu.memory_space<vmem>>, vector<1x4x256xf32>
    %1 = vector.shape_cast %0 : vector<1x4x256xf32> to vector<4x256xf32>
    %c0_2 = arith.constant 0 : index
    %c0_3 = arith.constant 0 : index
    %c0_4 = arith.constant 0 : index
    %2 = vector.load %arg3[%c0_2, %c0_3, %c0_4] : memref<2x32x1xf32, #tpu.memory_space<vmem>>, vector<1x32x1xf32>
    %3 = vector.shape_cast %2 : vector<1x32x1xf32> to vector<32x1xf32>
    %c0_5 = arith.constant 0 : index
    %c0_6 = arith.constant 0 : index
    %4 = vector.load %arg1[%c0_5, %c0_6] : memref<32x4xf32, #tpu.memory_space<vmem>>, vector<32x4xf32>
    %cst = arith.constant dense<0.000000e+00> : vector<32x256xf32>
    %5 = tpu.matmul %4, %1, %cst {dimension_numbers = #tpu.dot_dimension_numbers<[1], [0], [0], [1], [0, 0, 1, 1], [], []>} : vector<32x4xf32>, vector<4x256xf32>, vector<32x256xf32> -> vector<32x256xf32>
    %cst_7 = arith.constant 0.000000e+00 : f32
    %6 = vector.broadcast %cst_7 : f32 to vector<32x256xf32>
    %7 = arith.cmpf oeq, %5, %6 : vector<32x256xf32>
    %cst_8 = arith.constant 1.000000e+00 : f32
    %8 = vector.broadcast %cst_8 : f32 to vector<32x256xf32>
    %9 = arith.select %7, %8, %5 : vector<32x256xi1>, vector<32x256xf32>
    %cst_9 = arith.constant 0.000000e+00 : f32
    %10 = vector.broadcast %cst_9 : f32 to vector<32x1xf32>
    %11 = arith.subf %10, %3 : vector<32x1xf32>
    %cst_10 = arith.constant 7.000000e+00 : f32
    %12 = vector.broadcast %cst_10 : f32 to vector<32x1xf32>
    %13 = arith.mulf %11, %12 : vector<32x1xf32>
    %14 = vector.broadcast %13 : vector<32x1xf32> to vector<32x256xf32>
    %15 = arith.divf %14, %9 : vector<32x256xf32>
    %16 = math.floor %15 : vector<32x256xf32>
    %cst_11 = arith.constant 7.000000e+00 : f32
    %17 = vector.broadcast %cst_11 : f32 to vector<32x256xf32>
    %18 = arith.subf %17, %16 : vector<32x256xf32>
    %cst_12 = arith.constant 0.000000e+00 : f32
    %cst_13 = arith.constant 8.000000e+00 : f32
    %19 = vector.broadcast %cst_12 : f32 to vector<32x256xf32>
    %20 = arith.maximumf %19, %18 : vector<32x256xf32>
    %21 = vector.broadcast %cst_13 : f32 to vector<32x256xf32>
    %22 = arith.minimumf %21, %20 : vector<32x256xf32>
    %23 = math.ceil %15 : vector<32x256xf32>
    %cst_14 = arith.constant 0.000000e+00 : f32
    %cst_15 = arith.constant 8.000000e+00 : f32
    %24 = vector.broadcast %cst_14 : f32 to vector<32x256xf32>
    %25 = arith.maximumf %24, %23 : vector<32x256xf32>
    %26 = vector.broadcast %cst_15 : f32 to vector<32x256xf32>
    %27 = arith.minimumf %26, %25 : vector<32x256xf32>
    %cst_16 = arith.constant 0.000000e+00 : f32
    %28 = vector.broadcast %cst_16 : f32 to vector<32x1xf32>
    %29 = arith.cmpf ogt, %3, %28 : vector<32x1xf32>
    %cst_17 = arith.constant 8.000000e+00 : f32
    %cst_18 = arith.constant 0.000000e+00 : f32
    %30 = vector.broadcast %cst_17 : f32 to vector<32x1xf32>
    %31 = vector.broadcast %cst_18 : f32 to vector<32x1xf32>
    %32 = arith.select %29, %30, %31 : vector<32x1xi1>, vector<32x1xf32>
    %cst_19 = arith.constant 0.000000e+00 : f32
    %33 = vector.broadcast %cst_19 : f32 to vector<32x256xf32>
    %34 = arith.cmpf ogt, %5, %33 : vector<32x256xf32>
    %cst_20 = arith.constant 0.000000e+00 : f32
    %35 = vector.broadcast %cst_20 : f32 to vector<32x256xf32>
    %36 = arith.cmpf olt, %5, %35 : vector<32x256xf32>
    %37 = vector.shape_cast %32 : vector<32x1xf32> to vector<32x1xf32>
    %38 = vector.broadcast %37 : vector<32x1xf32> to vector<32x256xf32>
    %39 = arith.select %36, %27, %38 : vector<32x256xi1>, vector<32x256xf32>
    %40 = arith.select %34, %22, %39 : vector<32x256xi1>, vector<32x256xf32>
    %c0_21 = arith.constant 0 : index
    %c0_22 = arith.constant 0 : index
    %41 = vector.load %arg2[%c0_21, %c0_22] : memref<4x32xf32, #tpu.memory_space<vmem>>, vector<4x32xf32>
    %cst_23 = arith.constant dense<0.000000e+00> : vector<4x256xf32>
    %42 = tpu.matmul %41, %40, %cst_23 {dimension_numbers = #tpu.dot_dimension_numbers<[1], [0], [0], [1], [0, 0, 1, 1], [], []>} : vector<4x32xf32>, vector<32x256xf32>, vector<4x256xf32> -> vector<4x256xf32>
    %43 = arith.mulf %1, %42 : vector<4x256xf32>
    %c1 = arith.constant 1 : index
    %c0_24 = arith.constant 0 : index
    %c0_25 = arith.constant 0 : index
    %44 = vector.load %arg0[%c1, %c0_24, %c0_25] : memref<2x4x256xf32, #tpu.memory_space<vmem>>, vector<1x4x256xf32>
    %45 = vector.shape_cast %44 : vector<1x4x256xf32> to vector<4x256xf32>
    %c1_26 = arith.constant 1 : index
    %c0_27 = arith.constant 0 : index
    %c0_28 = arith.constant 0 : index
    %46 = vector.load %arg3[%c1_26, %c0_27, %c0_28] : memref<2x32x1xf32, #tpu.memory_space<vmem>>, vector<1x32x1xf32>
    %47 = vector.shape_cast %46 : vector<1x32x1xf32> to vector<32x1xf32>
    %c0_29 = arith.constant 0 : index
    %c0_30 = arith.constant 0 : index
    %48 = vector.load %arg1[%c0_29, %c0_30] : memref<32x4xf32, #tpu.memory_space<vmem>>, vector<32x4xf32>
    %cst_31 = arith.constant dense<0.000000e+00> : vector<32x256xf32>
    %49 = tpu.matmul %48, %45, %cst_31 {dimension_numbers = #tpu.dot_dimension_numbers<[1], [0], [0], [1], [0, 0, 1, 1], [], []>} : vector<32x4xf32>, vector<4x256xf32>, vector<32x256xf32> -> vector<32x256xf32>
    %cst_32 = arith.constant 0.000000e+00 : f32
    %50 = vector.broadcast %cst_32 : f32 to vector<32x256xf32>
    %51 = arith.cmpf oeq, %49, %50 : vector<32x256xf32>
    %cst_33 = arith.constant 1.000000e+00 : f32
    %52 = vector.broadcast %cst_33 : f32 to vector<32x256xf32>
    %53 = arith.select %51, %52, %49 : vector<32x256xi1>, vector<32x256xf32>
    %cst_34 = arith.constant 0.000000e+00 : f32
    %54 = vector.broadcast %cst_34 : f32 to vector<32x1xf32>
    %55 = arith.subf %54, %47 : vector<32x1xf32>
    %cst_35 = arith.constant 7.000000e+00 : f32
    %56 = vector.broadcast %cst_35 : f32 to vector<32x1xf32>
    %57 = arith.mulf %55, %56 : vector<32x1xf32>
    %58 = vector.broadcast %57 : vector<32x1xf32> to vector<32x256xf32>
    %59 = arith.divf %58, %53 : vector<32x256xf32>
    %60 = math.floor %59 : vector<32x256xf32>
    %cst_36 = arith.constant 7.000000e+00 : f32
    %61 = vector.broadcast %cst_36 : f32 to vector<32x256xf32>
    %62 = arith.subf %61, %60 : vector<32x256xf32>
    %cst_37 = arith.constant 0.000000e+00 : f32
    %cst_38 = arith.constant 8.000000e+00 : f32
    %63 = vector.broadcast %cst_37 : f32 to vector<32x256xf32>
    %64 = arith.maximumf %63, %62 : vector<32x256xf32>
    %65 = vector.broadcast %cst_38 : f32 to vector<32x256xf32>
    %66 = arith.minimumf %65, %64 : vector<32x256xf32>
    %67 = math.ceil %59 : vector<32x256xf32>
    %cst_39 = arith.constant 0.000000e+00 : f32
    %cst_40 = arith.constant 8.000000e+00 : f32
    %68 = vector.broadcast %cst_39 : f32 to vector<32x256xf32>
    %69 = arith.maximumf %68, %67 : vector<32x256xf32>
    %70 = vector.broadcast %cst_40 : f32 to vector<32x256xf32>
    %71 = arith.minimumf %70, %69 : vector<32x256xf32>
    %cst_41 = arith.constant 0.000000e+00 : f32
    %72 = vector.broadcast %cst_41 : f32 to vector<32x1xf32>
    %73 = arith.cmpf ogt, %47, %72 : vector<32x1xf32>
    %cst_42 = arith.constant 8.000000e+00 : f32
    %cst_43 = arith.constant 0.000000e+00 : f32
    %74 = vector.broadcast %cst_42 : f32 to vector<32x1xf32>
    %75 = vector.broadcast %cst_43 : f32 to vector<32x1xf32>
    %76 = arith.select %73, %74, %75 : vector<32x1xi1>, vector<32x1xf32>
    %cst_44 = arith.constant 0.000000e+00 : f32
    %77 = vector.broadcast %cst_44 : f32 to vector<32x256xf32>
    %78 = arith.cmpf ogt, %49, %77 : vector<32x256xf32>
    %cst_45 = arith.constant 0.000000e+00 : f32
    %79 = vector.broadcast %cst_45 : f32 to vector<32x256xf32>
    %80 = arith.cmpf olt, %49, %79 : vector<32x256xf32>
    %81 = vector.shape_cast %76 : vector<32x1xf32> to vector<32x1xf32>
    %82 = vector.broadcast %81 : vector<32x1xf32> to vector<32x256xf32>
    %83 = arith.select %80, %71, %82 : vector<32x256xi1>, vector<32x256xf32>
    %84 = arith.select %78, %66, %83 : vector<32x256xi1>, vector<32x256xf32>
    %c0_46 = arith.constant 0 : index
    %c0_47 = arith.constant 0 : index
    %85 = vector.load %arg2[%c0_46, %c0_47] : memref<4x32xf32, #tpu.memory_space<vmem>>, vector<4x32xf32>
    %cst_48 = arith.constant dense<0.000000e+00> : vector<4x256xf32>
    %86 = tpu.matmul %85, %84, %cst_48 {dimension_numbers = #tpu.dot_dimension_numbers<[1], [0], [0], [1], [0, 0, 1, 1], [], []>} : vector<4x32xf32>, vector<32x256xf32>, vector<4x256xf32> -> vector<4x256xf32>
    %87 = arith.mulf %45, %86 : vector<4x256xf32>
    %88 = arith.addf %43, %87 : vector<4x256xf32>
    %cst_49 = arith.constant dense<0xFF800000> : vector<256xf32>
    %89 = vector.multi_reduction <maximumf>, %88, %cst_49 [0] : vector<4x256xf32> to vector<256xf32>
    %90 = vector.shape_cast %89 : vector<256xf32> to vector<1x256xf32>
    %c0_50 = arith.constant 0 : index
    %c0_51 = arith.constant 0 : index
    %91 = vector.load %arg4[%c0_50, %c0_51] : memref<1x256xf32, #tpu.memory_space<vmem>>, vector<1x256xf32>
    tpu.vector_store %arg4[%c0_50, %c0_51], %90 {strides = array<i32>} : memref<1x256xf32, #tpu.memory_space<vmem>>, vector<1x256xf32>,
    return
  }
}

</mosaic_0001>

<bundles_post_ra>
// kernel: tpu_custom_call.1
= control target key start
LH: loop header
LB: loop body
LE: loop exit
PB: predicated region body
PF: predicated region fallthrough
CT: control target
= control target key end

     0   :  { %vm42_vm0 = vcmask 1043456   ;;  %v921_v2 = vmov 0.0   ;;  %vm29_vm1 = vcmask 31744   ;;  %v922_v5 = vmov 0   ;;  %s1264_s0 = inlined_call_operand.vmem [shape: f32[2,4,256], index: 0, kind: input, shape index: {}]   ;;  %s1265_s1 = inlined_call_operand.vmem [shape: f32[32,4], index: 1, kind: input, shape index: {}]   ;;  %s1266_s2 = inlined_call_operand.vmem [shape: f32[4,32], index: 2, kind: input, shape index: {}]   ;;  %s1267_s3 = inlined_call_operand.vmem [shape: f32[2,32,1], index: 3, kind: input, shape index: {}]   ;;  %s1268_s4 = inlined_call_operand.hbm [shape: f32[1,256], index: 4, kind: output, shape index: {}]  }
   0x1   :  { %v953_v0 = vld [vmem:[%s1264_s0] sm:$0xff]  ;;  %111 = vmatprep.mubr.f32.mxu0 %v921_v2  ;;  %381 = vmatprep.mubr.f32.mxu1 %v921_v2  ;;  %v21_v7 = vld [vmem:[%s1267_s3 + $0x10] sm:$0xff]  ;;  %v20_v8 = vld [vmem:[%s1267_s3 + $0x8] sm:$0xff] }
   0x2   :  { %v28_v1 = vcombine.high %v953_v0, %v953_v0  ;;  %v961_v3 = vld [vmem:[%s1265_s1] sm:$0xff]  ;;  %841 = vset.pattern.permute.xlu0 %v922_v5  ;;  %842 = vset.pattern.permute.xlu1 %v922_v5  ;;  %v22_v9 = vld [vmem:[%s1267_s3 + $0x18] sm:$0xff]  ;;  %v154_v10 = vsub.f32 0.0, %v21_v7  ;;  %v153_v11 = vsub.f32 0.0, %v20_v8  ;;  %vm253_vm3 = vcmp.gt.f32.partialorder %v20_v8, 0.0 }
   0x3   :  { %v19_v4 = vld [vmem:[%s1267_s3] sm:$0xff]  ;;  %v155_v12 = vsub.f32 0.0, %v22_v9  ;;  %vm254_vm4 = vcmp.gt.f32.partialorder %v21_v7, 0.0  ;;  %vm255_vm5 = vcmp.gt.f32.partialorder %v22_v9, 0.0 }
   0x4   :  { %v152_v6 = vsub.f32 0.0, %v19_v4  ;;  %802 = vmatprep.subr.msk.mxu0 %vm42_vm0, %v28_v1  ;;  %vm252_vm2 = vcmp.gt.f32.partialorder %v19_v4, 0.0  ;;  %v158_v14 = vmul.f32 7.0, %v154_v10 }
   0x5   :  { %803 = vmatpush1.msk.msra.mxu0 %vm42_vm0, %v953_v0 }
   0x6   :  { %v156_v13 = vmul.f32 7.0, %v152_v6  ;;  %804 = vmatmul.mubr.msk.f32.vlgmr.msra.gmra.mrb[0].mxu0 %vm29_vm1, %v961_v3 }
   0x7   :  { %9 = vsyncpa [#allocation3], 0  ;;  %117 = vmatprep.mubr.f32.mxu0 %v921_v2  ;;  %v985_v15 = vld [vmem:[%s1265_s1 + $0x8] sm:$0xff]  ;;  %v157_v16 = vmul.f32 7.0, %v153_v11  ;;  %172 = vperm.xlu1 %842, %v158_v14   ;;  %v159_v17 = vmul.f32 7.0, %v155_v12  ;;  %v256_v18 = vsel %vm252_vm2, 8.0, %v921_v2 }
   0x8   :  { %162 = vperm.xlu0 %841, %v156_v13   ;;  %v257_v19 = vsel %vm253_vm3, 8.0, %v921_v2  ;;  %v810_v20 = vld [vmem:[%s1267_s3 + $0x20] sm:$0xff]  ;;  %v258_v21 = vsel %vm254_vm4, 8.0, %v921_v2  ;;  %v259_v22 = vsel %vm255_vm5, 8.0, %v921_v2  ;;  %v811_v23 = vld [vmem:[%s1267_s3 + $0x28] sm:$0xff]  ;;  %v1003_v24 = vld [vmem:[%s1265_s1 + $0x10] sm:$0xff] }
   0x9   :  { %v843_v25 = vpack.i.bf16 %v257_v19, %v256_v18  ;;  %v511_v26 = vsub.f32 0.0, %v810_v20  ;;  %v848_v27 = vpack.i.bf16 %v259_v22, %v258_v21  ;;  %v512_v28 = vsub.f32 0.0, %v811_v23  ;;  %v812_v29 = vld [vmem:[%s1267_s3 + $0x30] sm:$0xff]  ;;  %v813_v30 = vld [vmem:[%s1267_s3 + $0x38] sm:$0xff] }
   0xa   :  { %805 = vmatmul.mubr.msk.f32.gmra.mrb[2].mxu0 %vm29_vm1, %v985_v15  ;;  %v1017_v31 = vld [vmem:[%s1265_s1 + $0x18] sm:$0xff]  ;;  %v513_v33 = vsub.f32 0.0, %v812_v29  ;;  %v514_v35 = vsub.f32 0.0, %v813_v30  ;;  %vm611_vm6 = vcmp.gt.f32.partialorder %v810_v20, 0.0  ;;  %vm612_vm7 = vcmp.gt.f32.partialorder %v811_v23, 0.0 }
   0xb   :  { %123 = vmatprep.mubr.f32.mxu0 %v921_v2  ;;  %177 = vperm.xlu1 %842, %v159_v17   ;;  %v515_v32 = vmul.f32 7.0, %v511_v26  ;;  %v516_v34 = vmul.f32 7.0, %v512_v28  ;;  %vm613_vm8 = vcmp.gt.f32.partialorder %v812_v29, 0.0  ;;  %vm614_vm9 = vcmp.gt.f32.partialorder %v813_v30, 0.0 }
   0xc   :  { %167 = vperm.xlu0 %841, %v157_v16   ;;  %v517_v36 = vmul.f32 7.0, %v513_v33  ;;  %v518_v37 = vmul.f32 7.0, %v514_v35  ;;  %v615_v38 = vsel %vm611_vm6, 8.0, %v921_v2  ;;  %v616_v39 = vsel %vm612_vm7, 8.0, %v921_v2 }
   0xd   :  { %v617_v40 = vsel %vm613_vm8, 8.0, %v921_v2  ;;  %v618_v41 = vsel %vm614_vm9, 8.0, %v921_v2  ;;  %v853_v42 = vpack.i.bf16 %v616_v39, %v615_v38 }
   0xe   :  { %806 = vmatmul.mubr.msk.f32.gmra.mrb[4].mxu0 %vm29_vm1, %v1003_v24  ;;  %v858_v43 = vpack.i.bf16 %v618_v41, %v617_v40 }
   0xf   :  { %129 = vmatprep.mubr.f32.mxu0 %v921_v2  ;;  %849 = vperm.xlu1 %842, %v848_v27  }
  0x10   :  { %844 = vperm.xlu0 %841, %v843_v25  }
  0x12   :  { %807 = vmatmul.mubr.msk.f32.gmra.mrb[6].mxu0 %vm29_vm1, %v1017_v31 }
  0x13   :  { %735 = vmatprep.mubr.f32.mxu0 %v921_v2  ;;  %526 = vperm.xlu1 %842, %v516_v34  }
  0x14   :  { %521 = vperm.xlu0 %841, %v515_v32  }
  0x17   :  { %536 = vperm.xlu1 %842, %v518_v37  }
  0x18   :  { %531 = vperm.xlu0 %841, %v517_v36  }
  0x1b   :  { %859 = vperm.xlu1 %842, %v858_v43  }
  0x1c   :  { %854 = vperm.xlu0 %841, %v853_v42  }
  0x86   :  { %v1034_v49 = vpop.permute.xlu1 %172 }
  0x87   :  { %v163_v46 = vpop.permute.xlu0 %162 }
  0x8a   :  { %v1046_v56 = vpop.permute.xlu1 %177 }
  0x8b   :  { %v168_v54 = vpop.permute.xlu0 %167 }
  0x8e   :  { %v1062_v4 = vpop.permute.xlu1 %849 }
  0x8f   :  { %v1060_v1 = vpop.permute.xlu0 %844  ;;  %v852_v11 = vunpack.i.h.bf16 %v1062_v4  ;;  %v851_v19 = vunpack.i.l.bf16 %v1062_v4 }
  0x90   :  { %v847_v9 = vunpack.i.h.bf16 %v1060_v1  ;;  %v846_v10 = vunpack.i.l.bf16 %v1060_v1 }
  0xd9   :  { %v1026_v44 = vpop.f32.mrb[0].mxu0 }
  0xda   :  { %vm136_vm10 = vcmp.eq.f32.partialorder %v1026_v44, 0.0  ;;  %v1029_v45 = vpop.f32.mrb[1].mxu0  ;;  %vm268_vm5 = vcmp.lt.f32.partialorder %v1026_v44, 0.0  ;;  %vm260_vm8 = vcmp.gt.f32.partialorder %v1026_v44, 0.0 }
  0xdb   :  { %v144_v47 = vsel %vm136_vm10, 1.0, %v1026_v44  ;;  %vm137_vm11 = vcmp.eq.f32.partialorder %v1029_v45, 0.0  ;;  %vm269_vm4 = vcmp.lt.f32.partialorder %v1029_v45, 0.0  ;;  %vm261_vm7 = vcmp.gt.f32.partialorder %v1029_v45, 0.0 }
  0xdc   :  { %865 = vrcp.f32 %v144_v47  ;;  %v145_v48 = vsel %vm137_vm11, 1.0, %v1029_v45 }
  0xdd   :  { %867 = vrcp.f32 %v145_v48  ;;  %v1036_v50 = vpop.f32.mrb[2].mxu0 }
  0xde   :  { %vm138_vm12 = vcmp.eq.f32.partialorder %v1036_v50, 0.0  ;;  %v1039_v51 = vpop.f32.mrb[3].mxu0  ;;  %vm270_vm6 = vcmp.lt.f32.partialorder %v1036_v50, 0.0  ;;  %vm262_vm9 = vcmp.gt.f32.partialorder %v1036_v50, 0.0 }
  0xdf   :  { %v146_v52 = vsel %vm138_vm12, 1.0, %v1036_v50  ;;  %vm139_vm13 = vcmp.eq.f32.partialorder %v1039_v51, 0.0  ;;  %vm263_vm10 = vcmp.gt.f32.partialorder %v1039_v51, 0.0  ;;  %vm271_vm11 = vcmp.lt.f32.partialorder %v1039_v51, 0.0 }
  0xe0   :  { %869 = vrcp.f32 %v146_v52  ;;  %v147_v53 = vsel %vm139_vm13, 1.0, %v1039_v51 }
  0xe1   :  { %871 = vrcp.f32 %v147_v53  ;;  %v1044_v55 = vpop.f32.mrb[4].mxu0 }
  0xe2   :  { %vm140_vm14 = vcmp.eq.f32.partialorder %v1044_v55, 0.0  ;;  %v1049_v57 = vpop.f32.mrb[5].mxu0  ;;  %vm272_vm12 = vcmp.lt.f32.partialorder %v1044_v55, 0.0 }
  0xe3   :  { %v148_v58 = vsel %vm140_vm14, 1.0, %v1044_v55  ;;  %vm141_vm15 = vcmp.eq.f32.partialorder %v1049_v57, 0.0  ;;  %vm265_vm13 = vcmp.gt.f32.partialorder %v1049_v57, 0.0  ;;  %vm273_vm14 = vcmp.lt.f32.partialorder %v1049_v57, 0.0 }
  0xe4   :  { %873 = vrcp.f32 %v148_v58  ;;  %v149_v59 = vsel %vm141_vm15, 1.0, %v1049_v57 }
  0xe5   :  { %875 = vrcp.f32 %v149_v59  ;;  %v1054_v60 = vpop.f32.mrb[6].mxu0 }
  0xe6   :  { %v866_v61 = vpop.eup %865  ;;  %vm142_vm2 = vcmp.eq.f32.partialorder %v1054_v60, 0.0  ;;  %v1057_v62 = vpop.f32.mrb[7].mxu0  ;;  %vm274_vm15 = vcmp.lt.f32.partialorder %v1054_v60, 0.0 }
  0xe7   :  { %v868_v63 = vpop.eup %867  ;;  %vm143_vm3 = vcmp.eq.f32.partialorder %v1057_v62, 0.0  ;;  %v150_v5 = vsel %vm142_vm2, 1.0, %v1054_v60  ;;  %v181_v8 = vmul.f32 %v866_v61, %v163_v46  ;;  %vm275_vm2 = vcmp.lt.f32.partialorder %v1057_v62, 0.0 }
  0xe8   :  { %v151_v6 = vsel %vm143_vm3, 1.0, %v1057_v62  ;;  %v183_v7 = vmul.f32 %v868_v63, %v163_v46  ;;  %vm267_vm3 = vcmp.gt.f32.partialorder %v1057_v62, 0.0 }
  0xe9   :  { %877 = vrcp.f32 %v151_v6  ;;  %v196_v16 = vfloor.f32 %v181_v8  ;;  %v228_v17 = vceil.f32 %v181_v8 }
  0xea   :  { %v870_v12 = vpop.eup %869  ;;  %v197_v13 = vfloor.f32 %v183_v7  ;;  %v229_v14 = vceil.f32 %v183_v7  ;;  %879 = vrcp.f32 %v150_v5 }
  0xeb   :  { %v872_v18 = vpop.eup %871  ;;  %v185_v20 = vmul.f32 %v870_v12, %v168_v54  ;;  %v204_v25 = vsub.f32 7.0, %v196_v16  ;;  %v236_v28 = vmax.f32 %v228_v17, 0.0 }
  0xec   :  { %v187_v21 = vmul.f32 %v872_v18, %v168_v54  ;;  %v205_v22 = vsub.f32 7.0, %v197_v13  ;;  %v237_v23 = vmax.f32 %v229_v14, 0.0 }
  0xed   :  { %v198_v26 = vfloor.f32 %v185_v20  ;;  %v230_v27 = vceil.f32 %v185_v20  ;;  %v212_v38 = vmax.f32 %v204_v25, 0.0  ;;  %v244_v63 = vmin.f32 %v236_v28, 8.0 }
  0xee   :  { %v874_v29 = vpop.eup %873  ;;  %v199_v30 = vfloor.f32 %v187_v21  ;;  %v213_v32 = vmax.f32 %v205_v22, 0.0  ;;  %v231_v33 = vceil.f32 %v187_v21  ;;  %v245_v34 = vmin.f32 %v237_v23, 8.0 }
  0xef   :  { %v876_v35 = vpop.eup %875  ;;  %v189_v36 = vmul.f32 %v874_v29, %v1034_v49  ;;  %v206_v37 = vsub.f32 7.0, %v198_v26  ;;  %v238_v39 = vmax.f32 %v230_v27, 0.0  ;;  %v220_v58 = vmin.f32 %v212_v38, 8.0 }
  0xf0   :  { %v191_v40 = vmul.f32 %v876_v35, %v1034_v49  ;;  %v207_v41 = vsub.f32 7.0, %v199_v30  ;;  %v239_v42 = vmax.f32 %v231_v33, 0.0  ;;  %v221_v46 = vmin.f32 %v213_v32, 8.0 }
  0xf1   :  { %v232_v43 = vceil.f32 %v189_v36  ;;  %v297_v47 = vsel %vm269_vm4, %v245_v34, %v846_v10  ;;  %v214_v48 = vmax.f32 %v206_v37, 0.0  ;;  %v246_v49 = vmin.f32 %v238_v39, 8.0 }
  0xf2   :  { %v233_v52 = vceil.f32 %v191_v40  ;;  %v215_v53 = vmax.f32 %v207_v41, 0.0  ;;  %v247_v54 = vmin.f32 %v239_v42, 8.0  ;;  %v305_v12 = vsel %vm261_vm7, %v221_v46, %v297_v47 }
  0xf3   :  { %v878_v59 = vpop.eup %877  ;;  %v222_v61 = vmin.f32 %v214_v48, 8.0  ;;  %v296_v13 = vsel %vm268_vm5, %v244_v63, %v846_v10  ;;  %v298_v14 = vsel %vm270_vm6, %v246_v49, %v847_v9  ;;  %v201_v16 = vfloor.f32 %v191_v40 }
  0xf4   :  { %v241_v1 = vmax.f32 %v233_v52, 0.0  ;;  %v223_v5 = vmin.f32 %v215_v53, 8.0  ;;  %v299_v6 = vsel %vm271_vm11, %v247_v54, %v847_v9  ;;  %v195_v7 = vmul.f32 %v878_v59, %v1046_v56  ;;  %v880_v8 = vpop.eup %879  ;;  %v1115_v52 = vld [vmem:[%s1264_s0 + $0x8] sm:$0xff] }
  0xf5   :  { %v240_v17 = vmax.f32 %v232_v43, 0.0  ;;  %v304_v20 = vsel %vm260_vm8, %v220_v58, %v296_v13  ;;  %v306_v21 = vsel %vm262_vm9, %v222_v61, %v298_v14  ;;  %v209_v10 = vsub.f32 7.0, %v201_v16  ;;  %v1126_v61 = vld [vmem:[%s1266_s2] sm:$0xf]  ;;  %s924_s2 = smov [#allocation2]  }
  0xf6   :  { %v307_v18 = vsel %vm263_vm10, %v223_v5, %v299_v6  ;;  %v249_v22 = vmin.f32 %v241_v1, 8.0  ;;  %v823_v23 = vpack.c.bf16 %v306_v21, %v304_v20  ;;  %v203_v25 = vfloor.f32 %v195_v7  ;;  %s794_s16 = sshll.u32 %s924_s2, 4  ;;  %s795_s16 = int_to_ptr.vmem [resolvable:$true] %s794_s16 }
  0xf7   :  { %v821_v45 = vpack.c.bf16 %v307_v18, %v305_v12  ;;  %v235_v26 = vceil.f32 %v195_v7  ;;  %v193_v9 = vmul.f32 %v880_v8, %v1046_v56  ;;  %v200_v51 = vfloor.f32 %v189_v36  ;;  %s897_s17 = scalar_lea.vmem %s795_s16, 32  ;;  %p902_p1 = scmp.lt.s32.totalorder %s795_s16, %s795_s16 }
  0xf8   :  { %v211_v44 = vsub.f32 7.0, %v203_v25  ;;  %v217_v50 = vmax.f32 %v209_v10, 0.0  ;;  %v248_v30 = vmin.f32 %v240_v17, 8.0  ;;  %v301_v32 = vsel %vm273_vm14, %v249_v22, %v851_v19  ;;  %p898_p0 = scmp.ne.s32.totalorder %s795_s16, %s897_s17  ;;  %p903_p2 = scmp.lt.s32.totalorder %s897_s17, %s897_s17 }
  0xf9   :  { %822 = vmatprep.subr.bf16.mxu1 %v821_v45  ;;  %v243_v27 = vmax.f32 %v235_v26, 0.0  ;;  %v202_v28 = vfloor.f32 %v193_v9  ;;  %v234_v29 = vceil.f32 %v193_v9  ;;  %v208_v34 = vsub.f32 7.0, %v200_v51 }
  0xfa   :  { %824 = vmatpush1.bf16.msra.mxu1 %v823_v23  ;;  %v219_v33 = vmax.f32 %v211_v44, 0.0  ;;  %v225_v35 = vmin.f32 %v217_v50, 8.0  ;;  %v300_v43 = vsel %vm272_vm12, %v248_v30, %v851_v19  ;;  %vm264_vm4 = vcmp.gt.f32.partialorder %v1044_v55, 0.0  ;;  %p904_p3 = por %p903_p2, %p902_p1 }
  0xfb   :  { %v251_v56 = vmin.f32 %v243_v27, 8.0  ;;  %v210_v37 = vsub.f32 7.0, %v202_v28  ;;  %v242_v38 = vmax.f32 %v234_v29, 0.0  ;;  %v216_v39 = vmax.f32 %v208_v34, 0.0 }
  0xfc   :  { %v227_v36 = vmin.f32 %v219_v33, 8.0  ;;  %v309_v46 = vsel %vm265_vm13, %v225_v35, %v301_v32  ;;  %vm266_vm5 = vcmp.gt.f32.partialorder %v1054_v60, 0.0  ;;  %v401_v58 = vcombine.high %v1115_v52, %v1115_v52  ;;  %v522_v60 = vpop.permute.xlu0 %521  ;;  %p905_p4 = pnand %p904_p3, %p898_p0 }
  0xfd   :  { %v303_v40 = vsel %vm275_vm2, %v251_v56, %v852_v11  ;;  %v218_v41 = vmax.f32 %v210_v37, 0.0  ;;  %v250_v42 = vmin.f32 %v242_v38, 8.0  ;;  %v224_v48 = vmin.f32 %v216_v39, 8.0 }
  0xfe   :  { %v311_v47 = vsel %vm267_vm3, %v227_v36, %v303_v40  ;;  %vm313_vm6 = vcmask 261120  }
  0xff   :  { %v825_v62 = vpack.c.bf16 %v311_v47, %v309_v46  ;;  %v226_v53 = vmin.f32 %v218_v41, 8.0  ;;  %v302_v54 = vsel %vm274_vm15, %v250_v42, %v852_v11  ;;  %v308_v19 = vsel %vm264_vm4, %v224_v48, %v300_v43 }
 0x101   :  { %826 = vmatprep.subr.bf16.mxu1 %v825_v62  ;;  %v310_v57 = vsel %vm266_vm5, %v226_v53, %v302_v54 }
 0x102   :  { %v827_v59 = vpack.c.bf16 %v310_v57, %v308_v19 }
 0x104   :  { %828 = vmatpush1.bf16.msra.mxu1 %v827_v59 }
 0x105   :  { %814 = vmatprep.subr.msk.mxu1 %vm42_vm0, %v401_v58 }
 0x107   :  { %808 = vmatmul.mubr.msk.f32.vlgmr.msra.gmra.mrb[0].mxu1 %vm313_vm6, %v1126_v61 }
 0x108   :  { %815 = vmatpush1.msk.msra.mxu1 %vm42_vm0, %v1115_v52  ;;  %470 = vmatprep.mubr.f32.mxu1 %v921_v2 }
 0x10b   :  { %816 = vmatmul.mubr.msk.f32.vlgmr.msra.gmra.mrb[2].mxu1 %vm29_vm1, %v961_v3  ;;  %v527_v3 = vpop.permute.xlu1 %526 }
 0x10c   :  { %476 = vmatprep.mubr.f32.mxu1 %v921_v2 }
 0x10f   :  { %817 = vmatmul.mubr.msk.f32.gmra.mrb[4].mxu1 %vm29_vm1, %v985_v15  ;;  %v1161_v49 = vpop.permute.xlu1 %536 }
 0x110   :  { %482 = vmatprep.mubr.f32.mxu1 %v921_v2 }
 0x113   :  { %818 = vmatmul.mubr.msk.f32.gmra.mrb[6].mxu1 %vm29_vm1, %v1003_v24  ;;  %v1158_v24 = vpop.permute.xlu0 %531  ;;  %v1178_v14 = vpop.permute.xlu1 %859 }
 0x114   :  { %488 = vmatprep.mubr.f32.mxu1 %v921_v2  ;;  %v862_v22 = vunpack.i.h.bf16 %v1178_v14  ;;  %v861_v25 = vunpack.i.l.bf16 %v1178_v14 }
 0x117   :  { %819 = vmatmul.mubr.msk.f32.gmra.mrb[8].mxu1 %vm29_vm1, %v1017_v31  ;;  %v1176_v13 = vpop.permute.xlu0 %854 }
 0x118   :  { %v857_v20 = vunpack.i.h.bf16 %v1176_v13  ;;  %v856_v21 = vunpack.i.l.bf16 %v1176_v13 }
 0x1da   :  { %v1145_v55 = vpop.f32.mrb[0].mxu1 }
 0x1db   :  { %v1147_v4 = vpop.f32.mrb[1].mxu1 }
 0x1dc   :  { %v390_v11 = vcombine.low %v1145_v55, %v1147_v4 }
 0x1de   :  { %v1151_v15 = vpop.f32.mrb[2].mxu1 }
 0x1df   :  { %vm495_vm7 = vcmp.eq.f32.partialorder %v1151_v15, 0.0  ;;  %v1154_v63 = vpop.f32.mrb[3].mxu1  ;;  %vm619_vm14 = vcmp.gt.f32.partialorder %v1151_v15, 0.0  ;;  %vm627_vm15 = vcmp.lt.f32.partialorder %v1151_v15, 0.0 }
 0x1e0   :  { %v503_v2 = vsel %vm495_vm7, 1.0, %v1151_v15  ;;  %vm496_vm8 = vcmp.eq.f32.partialorder %v1154_v63, 0.0  ;;  %vm620_vm2 = vcmp.gt.f32.partialorder %v1154_v63, 0.0  ;;  %vm628_vm3 = vcmp.lt.f32.partialorder %v1154_v63, 0.0 }
 0x1e1   :  { %881 = vrcp.f32 %v503_v2  ;;  %v504_v31 = vsel %vm496_vm8, 1.0, %v1154_v63 }
 0x1e2   :  { %883 = vrcp.f32 %v504_v31  ;;  %v1163_v1 = vpop.f32.mrb[4].mxu1 }
 0x1e3   :  { %vm497_vm1 = vcmp.eq.f32.partialorder %v1163_v1, 0.0  ;;  %v1166_v5 = vpop.f32.mrb[5].mxu1  ;;  %vm629_vm4 = vcmp.lt.f32.partialorder %v1163_v1, 0.0  ;;  %vm621_vm5 = vcmp.gt.f32.partialorder %v1163_v1, 0.0 }
 0x1e4   :  { %v505_v6 = vsel %vm497_vm1, 1.0, %v1163_v1  ;;  %vm498_vm9 = vcmp.eq.f32.partialorder %v1166_v5, 0.0  ;;  %vm630_vm7 = vcmp.lt.f32.partialorder %v1166_v5, 0.0  ;;  %vm622_vm8 = vcmp.gt.f32.partialorder %v1166_v5, 0.0 }
 0x1e5   :  { %885 = vrcp.f32 %v505_v6  ;;  %v506_v7 = vsel %vm498_vm9, 1.0, %v1166_v5 }
 0x1e6   :  { %887 = vrcp.f32 %v506_v7  ;;  %v1171_v8 = vpop.f32.mrb[6].mxu1 }
 0x1e7   :  { %vm499_vm10 = vcmp.eq.f32.partialorder %v1171_v8, 0.0  ;;  %v1174_v12 = vpop.f32.mrb[7].mxu1  ;;  %vm631_vm1 = vcmp.lt.f32.partialorder %v1171_v8, 0.0 }
 0x1e8   :  { %v507_v16 = vsel %vm499_vm10, 1.0, %v1171_v8  ;;  %vm500_vm11 = vcmp.eq.f32.partialorder %v1174_v12, 0.0  ;;  %vm623_vm10 = vcmp.gt.f32.partialorder %v1171_v8, 0.0 }
 0x1e9   :  { %889 = vrcp.f32 %v507_v16  ;;  %v508_v9 = vsel %vm500_vm11, 1.0, %v1174_v12 }
 0x1ea   :  { %v1182_v17 = vpop.f32.mrb[8].mxu1 }
 0x1eb   :  { %v882_v18 = vpop.eup %881  ;;  %vm501_vm12 = vcmp.eq.f32.partialorder %v1182_v17, 0.0  ;;  %v1188_v45 = vpop.f32.mrb[9].mxu1  ;;  %vm633_vm9 = vcmp.lt.f32.partialorder %v1182_v17, 0.0  ;;  %vm625_vm11 = vcmp.gt.f32.partialorder %v1182_v17, 0.0 }
 0x1ec   :  { %v884_v23 = vpop.eup %883  ;;  %v540_v10 = vmul.f32 %v882_v18, %v522_v60  ;;  %v509_v26 = vsel %vm501_vm12, 1.0, %v1182_v17  ;;  %vm502_vm13 = vcmp.eq.f32.partialorder %v1188_v45, 0.0  ;;  %vm634_vm12 = vcmp.lt.f32.partialorder %v1188_v45, 0.0 }
 0x1ed   :  { %891 = vrcp.f32 %v509_v26  ;;  %v510_v44 = vsel %vm502_vm13, 1.0, %v1188_v45  ;;  %v542_v51 = vmul.f32 %v884_v23, %v522_v60  ;;  %vm632_vm13 = vcmp.lt.f32.partialorder %v1174_v12, 0.0 }
 0x1ee   :  { %v555_v50 = vfloor.f32 %v540_v10  ;;  %v587_v27 = vceil.f32 %v540_v10  ;;  %893 = vrcp.f32 %v510_v44 }
 0x1ef   :  { %v886_v28 = vpop.eup %885  ;;  %v556_v29 = vfloor.f32 %v542_v51  ;;  %v588_v30 = vceil.f32 %v542_v51  ;;  %895 = vrcp.f32 %v508_v9 }
 0x1f0   :  { %v888_v32 = vpop.eup %887  ;;  %v563_v33 = vsub.f32 7.0, %v555_v50  ;;  %v595_v34 = vmax.f32 %v587_v27, 0.0  ;;  %v544_v35 = vmul.f32 %v886_v28, %v527_v3 }
 0x1f1   :  { %v546_v56 = vmul.f32 %v888_v32, %v527_v3  ;;  %v564_v37 = vsub.f32 7.0, %v556_v29  ;;  %v596_v38 = vmax.f32 %v588_v30, 0.0 }
 0x1f2   :  { %v571_v36 = vmax.f32 %v563_v33, 0.0  ;;  %v603_v39 = vmin.f32 %v595_v34, 8.0  ;;  %v557_v40 = vfloor.f32 %v544_v35  ;;  %v589_v41 = vceil.f32 %v544_v35 }
 0x1f3   :  { %v890_v42 = vpop.eup %889  ;;  %v558_v43 = vfloor.f32 %v546_v56  ;;  %v572_v46 = vmax.f32 %v564_v37, 0.0  ;;  %v590_v47 = vceil.f32 %v546_v56  ;;  %v604_v48 = vmin.f32 %v596_v38, 8.0 }
 0x1f4   :  { %v579_v62 = vmin.f32 %v571_v36, 8.0  ;;  %v655_v53 = vsel %vm627_vm15, %v603_v39, %v856_v21  ;;  %v565_v54 = vsub.f32 7.0, %v557_v40  ;;  %v597_v19 = vmax.f32 %v589_v41, 0.0 }
 0x1f5   :  { %v548_v57 = vmul.f32 %v890_v42, %v1158_v24  ;;  %v566_v58 = vsub.f32 7.0, %v558_v43  ;;  %v580_v59 = vmin.f32 %v572_v46, 8.0  ;;  %v598_v60 = vmax.f32 %v590_v47, 0.0 }
 0x1f6   :  { %v663_v3 = vsel %vm619_vm14, %v579_v62, %v655_v53  ;;  %v573_v2 = vmax.f32 %v565_v54, 0.0  ;;  %v605_v31 = vmin.f32 %v597_v19, 8.0  ;;  %v656_v6 = vsel %vm628_vm3, %v604_v48, %v856_v21 }
 0x1f7   :  { %v892_v7 = vpop.eup %891  ;;  %v559_v16 = vfloor.f32 %v548_v57  ;;  %v591_v18 = vceil.f32 %v548_v57  ;;  %v574_v23 = vmax.f32 %v566_v58, 0.0  ;;  %v606_v10 = vmin.f32 %v598_v60, 8.0 }
 0x1f8   :  { %v894_v26 = vpop.eup %893  ;;  %v581_v9 = vmin.f32 %v573_v2, 8.0  ;;  %v657_v44 = vsel %vm629_vm4, %v605_v31, %v857_v20  ;;  %v552_v15 = vmul.f32 %v892_v7, %v1161_v49  ;;  %v664_v51 = vsel %vm620_vm2, %v580_v59, %v656_v6 }
 0x1f9   :  { %v567_v50 = vsub.f32 7.0, %v559_v16  ;;  %v599_v27 = vmax.f32 %v591_v18, 0.0  ;;  %v554_v21 = vmul.f32 %v894_v26, %v1161_v49  ;;  %v582_v28 = vmin.f32 %v574_v23, 8.0  ;;  %v896_v29 = vpop.eup %895 }
 0x1fa   :  { %v665_v30 = vsel %vm621_vm5, %v581_v9, %v657_v44  ;;  %v561_v32 = vfloor.f32 %v552_v15  ;;  %v593_v33 = vceil.f32 %v552_v15  ;;  %v658_v34 = vsel %vm630_vm7, %v606_v10, %v857_v20 }
 0x1fb   :  { %v575_v35 = vmax.f32 %v567_v50, 0.0  ;;  %v607_v56 = vmin.f32 %v599_v27, 8.0  ;;  %v594_v63 = vceil.f32 %v554_v21  ;;  %v666_v37 = vsel %vm622_vm8, %v582_v28, %v658_v34 }
 0x1fc   :  { %v569_v38 = vsub.f32 7.0, %v561_v32  ;;  %v601_v49 = vmax.f32 %v593_v33, 0.0  ;;  %v829_v36 = vpack.c.bf16 %v666_v37, %v664_v51  ;;  %v831_v39 = vpack.c.bf16 %v665_v30, %v663_v3 }
 0x1fd   :  { %v602_v1 = vmax.f32 %v594_v63, 0.0  ;;  %v550_v13 = vmul.f32 %v896_v29, %v1158_v24  ;;  %v583_v40 = vmin.f32 %v575_v35, 8.0  ;;  %v562_v42 = vfloor.f32 %v554_v21 }
 0x1fe   :  { %v577_v41 = vmax.f32 %v569_v38, 0.0  ;;  %v609_v20 = vmin.f32 %v601_v49, 8.0  ;;  %830 = vmatprep.subr.bf16.mxu0 %v829_v36  ;;  %v659_v5 = vsel %vm631_vm1, %v607_v56, %v861_v25  ;;  %vm626_vm14 = vcmp.gt.f32.partialorder %v1188_v45, 0.0 }
 0x1ff   :  { %v610_v43 = vmin.f32 %v602_v1, 8.0  ;;  %832 = vmatpush1.bf16.msra.mxu0 %v831_v39  ;;  %v560_v46 = vfloor.f32 %v550_v13  ;;  %v592_v47 = vceil.f32 %v550_v13  ;;  %v570_v53 = vsub.f32 7.0, %v562_v42 }
 0x200   :  { %v585_v48 = vmin.f32 %v577_v41, 8.0  ;;  %v661_v62 = vsel %vm633_vm9, %v609_v20, %v862_v22  ;;  %v667_v19 = vsel %vm623_vm10, %v583_v40, %v659_v5  ;;  %vm624_vm15 = vcmp.gt.f32.partialorder %v1174_v12, 0.0 }
 0x201   :  { %v568_v24 = vsub.f32 7.0, %v560_v46  ;;  %v600_v54 = vmax.f32 %v592_v47, 0.0  ;;  %v578_v58 = vmax.f32 %v570_v53, 0.0  ;;  %v662_v59 = vsel %vm634_vm12, %v610_v43, %v862_v22 }
 0x202   :  { %v669_v57 = vsel %vm625_vm11, %v585_v48, %v661_v62  ;;  %v392_v45 = vmul.f32 %v390_v11, %v953_v0  ;;  %v923_v50 = vmov 1966171168   ;;  %v771_v21 = vlaneseq }
 0x203   :  { %v576_v60 = vmax.f32 %v568_v24, 0.0  ;;  %v608_v3 = vmin.f32 %v600_v54, 8.0  ;;  %v835_v2 = vpack.c.bf16 %v669_v57, %v667_v19  ;;  %v586_v31 = vmin.f32 %v578_v58, 8.0 }
 0x204   :  { %v769_v27 = vunpack.c.l.s4 %v923_v50 }
 0x205   :  { %v584_v8 = vmin.f32 %v576_v60, 8.0  ;;  %v660_v17 = vsel %vm632_vm13, %v608_v3, %v861_v25  ;;  %v670_v6 = vsel %vm626_vm14, %v586_v31, %v662_v59 }
 0x206   :  { %v770_v4 = vunpack.c.0.s8 %v769_v27 }
 0x207   :  { %v668_v7 = vsel %vm624_vm15, %v584_v8, %v660_v17 }
 0x208   :  { %v833_v16 = vpack.c.bf16 %v670_v6, %v668_v7 }
 0x20a   :  { %834 = vmatprep.subr.bf16.mxu0 %v833_v16 }
 0x20b   :  { %836 = vmatpush1.bf16.msra.mxu0 %v835_v2 }
 0x20e   :  { %820 = vmatmul.mubr.msk.f32.vlgmr.msra.gmra.mrb[8].mxu0 %vm313_vm6, %v1126_v61 }
 0x2e1   :  { %v737_v22 = vpop.f32.mrb[8].mxu0 }
 0x2e2   :  { %v739_v18 = vpop.f32.mrb[9].mxu0 }
 0x2e3   :  { %v744_v23 = vcombine.low %v737_v22, %v739_v18 }
 0x2e5   :  { %v746_v14 = vmul.f32 %v1115_v52, %v744_v23  ;;  %v772_v52 = vshrl.u32 %v771_v21, 7 }
 0x2e7   :  { %v747_v25 = vadd.f32 %v746_v14, %v392_v45  ;;  %v773_v33 = vsub.s32 %v770_v4, %v772_v52 }
 0x2e9   :  { %v749_v12 = vcombine.high %v747_v25, %v747_v25  ;;  %v751_v10 = vsel %vm42_vm0, %v747_v25, -inf }
 0x2ea   :  { %v752_v26 = vrot.slane %v751_v10, 4 }
 0x2eb   :  { %v758_v9 = vsel %vm42_vm0, %v749_v12, -inf  ;;  %vm785_vm0 = vcmp.lt.s32.totalorder %v771_v21, 256 }
 0x2ec   :  { %v753_v44 = vmax.f32 %v751_v10, %v752_v26  ;;  %v759_v15 = vrot.slane %v758_v9, 4 }
 0x2ee   :  { %v754_v61 = vrot.slane %v753_v44, 2  ;;  %v760_v51 = vmax.f32 %v758_v9, %v759_v15 }
 0x2f0   :  { %v755_v28 = vmax.f32 %v753_v44, %v754_v61  ;;  %v761_v29 = vrot.slane %v760_v51, 2 }
 0x2f2   :  { %v756_v55 = vrot.slane %v755_v28, 1  ;;  %v762_v0 = vmax.f32 %v760_v51, %v761_v29 }
 0x2f4   :  { %v763_v11 = vrot.slane %v762_v0, 1  ;;  %v757_v30 = vmax.f32 %v755_v28, %v756_v55 }
 0x2f6   :  { %v764_v32 = vmax.f32 %v762_v0, %v763_v11 }
 0x2f8   :  { %v767_v34 = vcombine.low %v757_v30, %v764_v32 }
 0x2fa   :  { %v774_v35 = vrot.slane %v767_v34, %v773_v33 }
 0x2fc   :  { %v781_v56 = vrot.slane %v774_v35, %v773_v33 }
 0x2fe   :  { %787 = vst.msk [vmem:[#allocation2] sm:$0x3] %vm785_vm0, %v781_v56 }
 0x2ff   :  { %908 = shalt.err (!%p905_p4)
}
 0x300   :  { %s909_s20 = scalar_lea.hbm %s1268_s4, 32 }
 0x301   :  { %p910_p5 = scmp.ne.s32.totalorder %s1268_s4, %s909_s20  ;;  %p913_p6 = scmp.lt.u32.totalorder %s909_s20, %s1268_s4 }
 0x303   :  { %p915_p7 = pnand %p913_p6, %p910_p5 }
 0x305   :  { %918 = shalt.err (!%p915_p7)
}
 0x306   :  { %797 = dma.vmem_to_hbm [thread:$0]  %s795_s16, 32, %s1268_s4, [#allocation3]  }
 0x307   :  { %919 = dma.done.wait [#allocation3], 32  }
 0x308   :  { %920 = vsyncadd [#allocation3], 4294967264 }
 0x309   :  { %801 = vsyncpa [#allocation3], 1 }

</bundles_post_ra>
